<compile_context>
chip_gen: v6e
topology: v6e:2x2x1
jax: 0.10.0
libtpu: 0.0.40
codegen_flags: <defaults>
</compile_context>

<pallas_src>
import functools

import jax
import jax.numpy as jnp
from jax.experimental import pallas as pl
from jax.experimental.pallas import tpu as pltpu

BN_EPS = 1e-5


# --------------------------------------------------------------------------- #
# Kernels
# --------------------------------------------------------------------------- #
def _gene_embedder_kernel(x_ref, w1_ref, gamma_ref, beta_ref, w2_ref, o_ref):
    """Single-block fused forward (whole batch fits in one VMEM block)."""
    # MXU is bf16-native: bf16 operands, f32 accumulation.
    x = x_ref[...].astype(jnp.bfloat16)
    w1 = w1_ref[...].astype(jnp.bfloat16)
    h = jnp.dot(x, w1, preferred_element_type=jnp.float32)            # (N, D_in) f32

    # One-pass training-mode batch statistics, f32 throughout.
    inv_n = 1.0 / x_ref.shape[0]                                      # static
    mean = jnp.sum(h, axis=0, keepdims=True) * inv_n
    var = jnp.sum(h * h, axis=0, keepdims=True) * inv_n - mean * mean
    var = jnp.maximum(var, 0.0)                                       # cancellation guard

    # Folded BN affine + ReLU: relu(h * scale + shift); rsqrt lives on the EUP slot.
    scale = gamma_ref[...] * jax.lax.rsqrt(var + BN_EPS)
    shift = beta_ref[...] - mean * scale
    a = jnp.maximum(h * scale + shift, 0.0).astype(jnp.bfloat16)

    o_ref[...] = jnp.dot(
        a, w2_ref[...].astype(jnp.bfloat16), preferred_element_type=jnp.float32
    ).astype(o_ref.dtype)


def _gene_embedder_tiled_kernel(
    x_ref, w1_ref, gamma_ref, beta_ref, w2_ref, o_ref, stats_ref, *, n_total
):
    """Two-phase tiled forward for large batches (full-batch BN statistics).

    grid = (2, N // block_n).  Phase 0 accumulates full-batch sum / sum-of-squares
    into a persistent VMEM scratch; phase 1 recomputes the cheap (K = D_in) first
    matmul per tile and applies BN + ReLU + second matmul.  Recomputing x @ w1
    avoids an HBM round trip for the hidden activations.
    """
    phase = pl.program_id(0)
    tile = pl.program_id(1)

    x = x_ref[...].astype(jnp.bfloat16)
    w1 = w1_ref[...].astype(jnp.bfloat16)
    h = jnp.dot(x, w1, preferred_element_type=jnp.float32)            # (tile_n, D_in) f32

    @pl.when(phase == 0)
    def _stats():
        @pl.when(tile == 0)
        def _init():
            stats_ref[...] = jnp.zeros_like(stats_ref)

        stats_ref[0:1, :] = stats_ref[0:1, :] + jnp.sum(h, axis=0, keepdims=True)
        stats_ref[1:2, :] = stats_ref[1:2, :] + jnp.sum(h * h, axis=0, keepdims=True)
        # This output block is revisited (and overwritten) in phase 1; write zeros
        # so the intermediate writeback is deterministic.
        o_ref[...] = jnp.zeros_like(o_ref)

    @pl.when(phase == 1)
    def _apply():
        inv_n = 1.0 / n_total                                          # static
        mean = stats_ref[0:1, :] * inv_n
        var = jnp.maximum(stats_ref[1:2, :] * inv_n - mean * mean, 0.0)
        scale = gamma_ref[...] * jax.lax.rsqrt(var + BN_EPS)
        shift = beta_ref[...] - mean * scale
        a = jnp.maximum(h * scale + shift, 0.0).astype(jnp.bfloat16)
        o_ref[...] = jnp.dot(
            a, w2_ref[...].astype(jnp.bfloat16), preferred_element_type=jnp.float32
        ).astype(o_ref.dtype)


# --------------------------------------------------------------------------- #
# Wrapper
# --------------------------------------------------------------------------- #
def gene_embedder(x, w1, b1, gamma, beta, w2, *, block_n=512):
    """Fused GeneEmbedder forward (n_layers=1, dropout=0, training-mode BN).

    x: (N, D_in) f32; w1: (D_in, D_in) [in, out]; b1/gamma/beta: (1, D_in);
    w2: (D_in, D_out) [in, out].  Returns (N, D_out) f32.

    b1 is accepted for interface parity with the PyTorch module but not used:
    training-mode BatchNorm subtracts the per-feature batch mean, which cancels a
    constant per-feature bias exactly.
    # TODO(synk): this cancellation (and the batch-stats path) only holds in
    # training mode; eval mode (running_mean/running_var) would need b1 + buffers.
    """
    del b1
    n, d_in = x.shape
    d_out = w2.shape[1]
    gamma = jnp.reshape(gamma, (1, d_in)).astype(jnp.float32)
    beta = jnp.reshape(beta, (1, d_in)).astype(jnp.float32)

    # NOTE: no per-call padding of x / params / output and no output slicing —
    # full-extent blocks are legal even though D_in/D_out are not lane multiples,
    # and the masked stores are negligible next to pad/slice HBM round trips.

    if n > block_n and n % block_n == 0 and block_n % 8 == 0:
        # Production-style path: grid over the batch axis, full-batch BN stats.
        n_tiles = n // block_n
        kernel = functools.partial(_gene_embedder_tiled_kernel, n_total=float(n))
        flops = 2 * (2 * n * d_in * d_in) + 2 * n * d_in * d_out + 8 * n * d_in
        bytes_accessed = 4 * (
            2 * n * d_in + d_in * d_in + 2 * d_in + d_in * d_out + 2 * n * d_out
        )
        return pl.pallas_call(
            kernel,
            out_shape=jax.ShapeDtypeStruct((n, d_out), jnp.float32),
            grid=(2, n_tiles),
            in_specs=[
                pl.BlockSpec((block_n, d_in), lambda p, i: (i, 0)),
                pl.BlockSpec((d_in, d_in), lambda p, i: (0, 0)),
                pl.BlockSpec((1, d_in), lambda p, i: (0, 0)),
                pl.BlockSpec((1, d_in), lambda p, i: (0, 0)),
                pl.BlockSpec((d_in, d_out), lambda p, i: (0, 0)),
            ],
            out_specs=pl.BlockSpec((block_n, d_out), lambda p, i: (i, 0)),
            scratch_shapes=[pltpu.VMEM((2, d_in), jnp.float32)],
            compiler_params=pltpu.CompilerParams(
                # Both axes carry the full-batch stats scratch -> sequential.
                # TODO(synk): for v7x megacore, shard only the phase-1 apply pass
                # across cores (stats must remain full-batch).
                dimension_semantics=("arbitrary", "arbitrary"),
            ),
            cost_estimate=pl.CostEstimate(
                flops=flops, transcendentals=d_in, bytes_accessed=bytes_accessed
            ),
        )(x, w1, gamma, beta, w2)

    # Small-batch path: everything fits comfortably in a single VMEM block.
    full = lambda shape: pl.BlockSpec(shape, lambda: (0,) * len(shape))
    flops = 2 * n * d_in * d_in + 2 * n * d_in * d_out + 8 * n * d_in
    bytes_accessed = 4 * (
        n * d_in + d_in * d_in + 2 * d_in + d_in * d_out + n * d_out
    )
    return pl.pallas_call(
        _gene_embedder_kernel,
        out_shape=jax.ShapeDtypeStruct((n, d_out), jnp.float32),
        grid=(),
        in_specs=[
            full((n, d_in)),
            full((d_in, d_in)),
            full((1, d_in)),
            full((1, d_in)),
            full((d_in, d_out)),
        ],
        out_specs=full((n, d_out)),
        cost_estimate=pl.CostEstimate(
            flops=flops, transcendentals=d_in, bytes_accessed=bytes_accessed
        ),
    )(x, w1, gamma, beta, w2)


# --------------------------------------------------------------------------- #
# Reference (exact f32, matches the PyTorch module in training mode)
# --------------------------------------------------------------------------- #
def gene_embedder_ref(x, w1, b1, gamma, beta, w2):
    h = x @ w1 + b1
    mean = jnp.mean(h, axis=0, keepdims=True)
    var = jnp.mean((h - mean) ** 2, axis=0, keepdims=True)
    h = (h - mean) / jnp.sqrt(var + BN_EPS) * gamma + beta
    h = jnp.maximum(h, 0.0)
    return h @ w2


if __name__ == "__main__":
    D_IN = 32    # n_input_dimensions
    D_OUT = 16   # n_output_dimensions

    key = jax.random.PRNGKey(0)
    kx, kw1, kb1, kg, kb, kw2, kx2 = jax.random.split(key, 7)

    bound = 1.0 / (D_IN ** 0.5)
    w1 = jax.random.uniform(kw1, (D_IN, D_IN), minval=-bound, maxval=bound,
                            dtype=jnp.float32)
    b1 = jax.random.uniform(kb1, (1, D_IN), minval=-bound, maxval=bound,
                            dtype=jnp.float32)
    gamma = 1.0 + 0.1 * jax.random.normal(kg, (1, D_IN), dtype=jnp.float32)
    beta = 0.1 * jax.random.normal(kb, (1, D_IN), dtype=jnp.float32)
    w2 = jax.random.uniform(kw2, (D_IN, D_OUT), minval=-bound, maxval=bound,
                            dtype=jnp.float32)

    # 1) Small-batch path (single VMEM block), N = 8 genes.
    N = 8
    x = jax.random.normal(kx, (N, D_IN), dtype=jnp.float32)
    out = jax.block_until_ready(gene_embedder(x, w1, b1, gamma, beta, w2))
    ref = gene_embedder_ref(x, w1, b1, gamma, beta, w2)
    assert out.shape == (N, D_OUT)
    assert jnp.allclose(out, ref, atol=5e-2, rtol=5e-2), "small-batch mismatch vs reference"

    # 2) Tiled two-phase path (grid over batch, full-batch BN statistics).
    N2, BLOCK_N = 512, 128
    x2 = jax.random.normal(kx2, (N2, D_IN), dtype=jnp.float32)
    out2 = jax.block_until_ready(
        gene_embedder(x2, w1, b1, gamma, beta, w2, block_n=BLOCK_N)
    )
    ref2 = gene_embedder_ref(x2, w1, b1, gamma, beta, w2)
    assert out2.shape == (N2, D_OUT)
    assert jnp.allclose(out2, ref2, atol=5e-2, rtol=5e-2), "tiled mismatch vs reference"

    # TODO(synk): BatchNorm1d running_mean/running_var buffer updates (training-mode
    # side effect of the PyTorch module) are not emitted by this fused forward.
    print("KERNEL_OK")
</pallas_src>

<mosaic_0001>
module attributes {stable_mosaic.version = 11 : i64} {
  func.func @_gene_embedder_kernel(%arg0: memref<8x32xf32, #tpu.memory_space<vmem>>, %arg1: memref<32x32xf32, #tpu.memory_space<vmem>>, %arg2: memref<1x32xf32, #tpu.memory_space<vmem>>, %arg3: memref<1x32xf32, #tpu.memory_space<vmem>>, %arg4: memref<32x16xf32, #tpu.memory_space<vmem>>, %arg5: memref<8x16xf32, #tpu.memory_space<vmem>>) attributes {dimension_semantics = [], scalar_prefetch = 0 : i64, scratch_operands = 0 : i64, tpu.core_type = #tpu.core_type<tc>} {
    %c0 = arith.constant 0 : index
    %c0_0 = arith.constant 0 : index
    %0 = vector.load %arg0[%c0, %c0_0] : memref<8x32xf32, #tpu.memory_space<vmem>>, vector<8x32xf32>
    %1 = arith.truncf %0 : vector<8x32xf32> to vector<8x32xbf16>
    %c0_1 = arith.constant 0 : index
    %c0_2 = arith.constant 0 : index
    %2 = vector.load %arg1[%c0_1, %c0_2] : memref<32x32xf32, #tpu.memory_space<vmem>>, vector<32x32xf32>
    %3 = arith.truncf %2 : vector<32x32xf32> to vector<32x32xbf16>
    %cst = arith.constant dense<0.000000e+00> : vector<8x32xf32>
    %4 = tpu.matmul %1, %3, %cst {dimension_numbers = #tpu.dot_dimension_numbers<[1], [0], [0], [1], [0, 0, 1, 1], [], []>} : vector<8x32xbf16>, vector<32x32xbf16>, vector<8x32xf32> -> vector<8x32xf32>
    %cst_3 = arith.constant dense<0.000000e+00> : vector<32xf32>
    %5 = vector.multi_reduction <add>, %4, %cst_3 [0] : vector<8x32xf32> to vector<32xf32>
    %6 = vector.shape_cast %5 : vector<32xf32> to vector<1x32xf32>
    %cst_4 = arith.constant 1.250000e-01 : f32
    %7 = vector.broadcast %cst_4 : f32 to vector<1x32xf32>
    %8 = arith.mulf %6, %7 : vector<1x32xf32>
    %9 = arith.mulf %4, %4 : vector<8x32xf32>
    %cst_5 = arith.constant dense<0.000000e+00> : vector<32xf32>
    %10 = vector.multi_reduction <add>, %9, %cst_5 [0] : vector<8x32xf32> to vector<32xf32>
    %11 = vector.shape_cast %10 : vector<32xf32> to vector<1x32xf32>
    %cst_6 = arith.constant 1.250000e-01 : f32
    %12 = vector.broadcast %cst_6 : f32 to vector<1x32xf32>
    %13 = arith.mulf %11, %12 : vector<1x32xf32>
    %14 = arith.mulf %8, %8 : vector<1x32xf32>
    %15 = arith.subf %13, %14 : vector<1x32xf32>
    %cst_7 = arith.constant 0.000000e+00 : f32
    %16 = vector.broadcast %cst_7 : f32 to vector<1x32xf32>
    %17 = arith.maximumf %15, %16 : vector<1x32xf32>
    %c0_8 = arith.constant 0 : index
    %c0_9 = arith.constant 0 : index
    %18 = vector.load %arg2[%c0_8, %c0_9] : memref<1x32xf32, #tpu.memory_space<vmem>>, vector<1x32xf32>
    %cst_10 = arith.constant 9.99999974E-6 : f32
    %19 = vector.broadcast %cst_10 : f32 to vector<1x32xf32>
    %20 = arith.addf %17, %19 : vector<1x32xf32>
    %21 = math.rsqrt %20 : vector<1x32xf32>
    %22 = arith.mulf %18, %21 : vector<1x32xf32>
    %c0_11 = arith.constant 0 : index
    %c0_12 = arith.constant 0 : index
    %23 = vector.load %arg3[%c0_11, %c0_12] : memref<1x32xf32, #tpu.memory_space<vmem>>, vector<1x32xf32>
    %24 = arith.mulf %8, %22 : vector<1x32xf32>
    %25 = arith.subf %23, %24 : vector<1x32xf32>
    %26 = vector.broadcast %22 : vector<1x32xf32> to vector<8x32xf32>
    %27 = arith.mulf %4, %26 : vector<8x32xf32>
    %28 = vector.broadcast %25 : vector<1x32xf32> to vector<8x32xf32>
    %29 = arith.addf %27, %28 : vector<8x32xf32>
    %cst_13 = arith.constant 0.000000e+00 : f32
    %30 = vector.broadcast %cst_13 : f32 to vector<8x32xf32>
    %31 = arith.maximumf %29, %30 : vector<8x32xf32>
    %32 = arith.truncf %31 : vector<8x32xf32> to vector<8x32xbf16>
    %c0_14 = arith.constant 0 : index
    %c0_15 = arith.constant 0 : index
    %33 = vector.load %arg4[%c0_14, %c0_15] : memref<32x16xf32, #tpu.memory_space<vmem>>, vector<32x16xf32>
    %34 = arith.truncf %33 : vector<32x16xf32> to vector<32x16xbf16>
    %cst_16 = arith.constant dense<0.000000e+00> : vector<8x16xf32>
    %35 = tpu.matmul %32, %34, %cst_16 {dimension_numbers = #tpu.dot_dimension_numbers<[1], [0], [0], [1], [0, 0, 1, 1], [], []>} : vector<8x32xbf16>, vector<32x16xbf16>, vector<8x16xf32> -> vector<8x16xf32>
    %c0_17 = arith.constant 0 : index
    %c0_18 = arith.constant 0 : index
    %36 = vector.load %arg5[%c0_17, %c0_18] : memref<8x16xf32, #tpu.memory_space<vmem>>, vector<8x16xf32>
    tpu.vector_store %arg5[%c0_17, %c0_18], %35 {strides = array<i32>} : memref<8x16xf32, #tpu.memory_space<vmem>>, vector<8x16xf32>,
    return
  }
}

</mosaic_0001>

<bundles_post_ra>
// kernel: tpu_custom_call.1
= control target key start
LH: loop header
LB: loop body
LE: loop exit
PB: predicated region body
PF: predicated region fallthrough
CT: control target
= control target key end

     0   :  { %v233_v3 = vmov 0.0   ;;  %vm234_vm0 = vmmov 0   ;;  %s306_s0 = inlined_call_operand.vmem [shape: f32[8,32], index: 0, kind: input, shape index: {}]   ;;  %s307_s1 = inlined_call_operand.vmem [shape: f32[32,32], index: 1, kind: input, shape index: {}]   ;;  %s308_s2 = inlined_call_operand.vmem [shape: f32[1,32], index: 2, kind: input, shape index: {}]   ;;  %s309_s3 = inlined_call_operand.vmem [shape: f32[1,32], index: 3, kind: input, shape index: {}]   ;;  %s310_s4 = inlined_call_operand.vmem [shape: f32[32,16], index: 4, kind: input, shape index: {}]   ;;  %s311_s5 = inlined_call_operand.hbm [shape: f32[8,16], index: 5, kind: output, shape index: {}]  }
   0x1   :  { %v26_v0 = vld [vmem:[%s307_s1 + $0x10] sm:$0xff]  ;;  %v27_v1 = vld [vmem:[%s307_s1 + $0x18] sm:$0xff]  ;;  %v24_v2 = vld [vmem:[%s307_s1] sm:$0xff]  ;;  %190 = vmatprep.subr.bf16.mxu0 %v233_v3  ;;  %194 = vmatprep.mubr.msk.bf16.mxu0 %vm234_vm0, %v233_v3 }
   0x2   :  { %v29_v4 = vpack.c.bf16 %v27_v1, %v26_v0  ;;  %v25_v5 = vld [vmem:[%s307_s1 + $0x8] sm:$0xff] }
   0x3   :  { %10 = vsyncpa [#allocation3], 0  ;;  %198 = vmatprep.subr.bf16.mxu1 %v233_v3  ;;  %202 = vmatprep.mubr.msk.bf16.mxu1 %vm234_vm0, %v233_v3  ;;  %v28_v6 = vpack.c.bf16 %v25_v5, %v24_v2  ;;  %v22_v7 = vld [vmem:[%s306_s0] sm:$0xff]  ;;  %vm30_vm1 = vcmask 261120   ;;  %v119_v9 = vld [vmem:[%s310_s4 + $0x10] sm:$0xff]  ;;  %v102_v40 = vlaneseq  ;;  %s235_s12 = smov [#allocation2]  }
   0x4   :  { %191 = vmatpush3.bf16.msra.mxu0 %v29_v4  ;;  %v23_v8 = vpack.c.bf16 %v22_v7, %v22_v7  ;;  %v120_v10 = vld [vmem:[%s310_s4 + $0x18] sm:$0xff]  ;;  %v117_v12 = vld [vmem:[%s310_s4] sm:$0xff]  ;;  %v118_v13 = vld [vmem:[%s310_s4 + $0x8] sm:$0xff]  ;;  %s174_s13 = sshll.u32 %s235_s12, 4  ;;  %vm166_vm2 = vcmask 130048   ;;  %s175_s13 = int_to_ptr.vmem [resolvable:$true] %s174_s13 }
   0x5   :  { %192 = vmatprep.subr.bf16.mxu0 %v233_v3  ;;  %v122_v11 = vpack.c.bf16 %v120_v10, %v119_v9  ;;  %v121_v14 = vpack.c.bf16 %v118_v13, %v117_v12  ;;  %v103_v41 = vshrl.u32 %v102_v40, 7  ;;  %v94_v42 = vld [vmem:[%s308_s2] sm:$0x1]  ;;  %s211_s2 = scalar_lea.vmem %s175_s13, 128  ;;  %p216_p1 = scmp.lt.s32.totalorder %s175_s13, %s175_s13 }
   0x6   :  { %v98_v46 = vld [vmem:[%s309_s3] sm:$0x1]  ;;  %p212_p0 = scmp.ne.s32.totalorder %s175_s13, %s211_s2  ;;  %p217_p2 = scmp.lt.s32.totalorder %s211_s2, %s211_s2 }
   0x7   :  { %199 = vmatpush3.bf16.msra.mxu1 %v122_v11  ;;  %v104_v43 = vsub.s32 0, %v103_v41 }
   0x8   :  { %193 = vmatpush3.bf16.msra.mxu0 %v28_v6  ;;  %200 = vmatprep.subr.bf16.mxu1 %v233_v3  ;;  %p218_p3 = por %p217_p2, %p216_p1 }
   0xa   :  { %p219_p4 = pnand %p218_p3, %p212_p0 }
   0xb   :  { %195 = vmatmul.mubr.msk.bf16.vlgmr.msra.gmra.mxu0 %vm30_vm1, %v23_v8  ;;  %201 = vmatpush3.bf16.msra.mxu1 %v121_v14 }
  0xcb   :  { %v68_v15 = vpop.f32.mrf.mxu0 }
  0xcc   :  { %v74_v16 = vsel %vm30_vm1, %v68_v15, 0.0  ;;  %v82_v17 = vmul.f32 %v68_v15, %v68_v15 }
  0xcd   :  { %v75_v18 = vrot.slane %v74_v16, 4  ;;  %v196_v19 = vpop.f32.mrf.mxu0 }
  0xce   :  { %v83_v20 = vsel %vm30_vm1, %v82_v17, 0.0 }
  0xcf   :  { %v76_v21 = vadd.f32 %v75_v18, %v74_v16  ;;  %v84_v22 = vrot.slane %v83_v20, 4  ;;  %v71_v23 = vpop.f32.mrf.mxu0 }
  0xd1   :  { %v77_v24 = vrot.slane %v76_v21, 2  ;;  %v85_v25 = vadd.f32 %v84_v22, %v83_v20  ;;  %v197_v26 = vpop.f32.mrf.mxu0 }
  0xd3   :  { %v78_v27 = vadd.f32 %v77_v24, %v76_v21  ;;  %v86_v28 = vrot.slane %v85_v25, 2 }
  0xd5   :  { %v79_v29 = vrot.slane %v78_v27, 1  ;;  %v87_v30 = vadd.f32 %v86_v28, %v85_v25 }
  0xd7   :  { %v80_v31 = vadd.f32 %v79_v29, %v78_v27  ;;  %v88_v32 = vrot.slane %v87_v30, 1 }
  0xd9   :  { %v81_v33 = vmul.f32 0.125, %v80_v31  ;;  %v89_v34 = vadd.f32 %v88_v32, %v87_v30 }
  0xdb   :  { %v90_v35 = vmul.f32 0.125, %v89_v34  ;;  %v91_v36 = vmul.f32 %v81_v33, %v81_v33 }
  0xdd   :  { %v92_v37 = vsub.f32 %v90_v35, %v91_v36 }
  0xdf   :  { %v93_v38 = vmax.f32 %v92_v37, 0.0 }
  0xe1   :  { %v95_v39 = vadd.f32 1e-05, %v93_v38 }
  0xe3   :  { %209 = vrsqrt.f32 %v95_v39 }
  0xf0   :  { %v210_v44 = vpop.eup %209 }
  0xf1   :  { %v97_v45 = vmul.f32 %v210_v44, %v94_v42 }
  0xf3   :  { %v99_v47 = vmul.f32 %v97_v45, %v81_v33  ;;  %v105_v48 = vrot.slane %v97_v45, %v104_v43 }
  0xf5   :  { %v100_v49 = vsub.f32 %v98_v46, %v99_v47  ;;  %v107_v50 = vmul.f32 %v105_v48, %v68_v15 }
  0xf7   :  { %v112_v51 = vrot.slane %v100_v49, %v104_v43 }
  0xf9   :  { %v114_v52 = vadd.f32 %v112_v51, %v107_v50 }
  0xfb   :  { %v115_v53 = vmax.f32 %v114_v52, 0.0 }
  0xfd   :  { %v116_v54 = vpack.c.bf16 %v115_v53, %v115_v53 }
  0xff   :  { %203 = vmatmul.mubr.msk.bf16.vlgmr.msra.gmra.mxu1 %vm30_vm1, %v116_v54 }
 0x1bf   :  { %v160_v55 = vpop.f32.mrf.mxu1 }
 0x1c0   :  { %167 = vst.msk [vmem:[#allocation2] sm:$0xff] %vm166_vm2, %v160_v55 }
 0x1c1   :  { %v204_v56 = vpop.f32.mrf.mxu1 }
 0x1c2   :  { %222 = shalt.err (!%p219_p4)
}
 0x1c3   :  { %177 = dma.vmem_to_hbm [thread:$0]  %s175_s13, 128, %s311_s5, [#allocation3]   ;;  %v163_v57 = vpop.f32.mrf.mxu1 }
 0x1c5   :  { %v205_v58 = vpop.f32.mrf.mxu1 }
 0x1c6   :  { %231 = dma.done.wait [#allocation3], 128  }
 0x1c7   :  { %232 = vsyncadd [#allocation3], 4294967168 }
 0x1c8   :  { %181 = vsyncpa [#allocation3], 1 }

</bundles_post_ra>
